<compile_context>
chip_gen: v5e
topology: v5e:2x2
jax: 0.10.0
libtpu: 0.0.40
codegen_flags: <defaults>
</compile_context>

<pallas_src>
import jax
import jax.numpy as jnp
from jax.experimental import pallas as pl
from jax.experimental.pallas import tpu as pltpu

_LANE = 128  # lane-dense output width


def _embedding_kernel(wids_ref, p1ids_ref, p2ids_ref,   # scalar-prefetch ids (SMEM)
                      wrow_ref, p1tab_ref, p2tab_ref,   # gathered word row + resident pos tables
                      out_ref):                          # (1, 1, 128) output row
    del wids_ref  # word id is consumed by the word-table index_map (row gather)
    i = pl.program_id(0)
    dw = wrow_ref.shape[-1]

    p1 = p1ids_ref[i]
    p2 = p2ids_ref[i]

    # Pos rows are pre-placed at columns [Dw, Dw+Dp) and [Dw+Dp, Dw+2Dp) of a
    # zeroed 128-wide slab, so a single add yields the already-"concatenated"
    # pos part of the output row (pad lanes stay zero).
    pos_row = p1tab_ref[pl.ds(p1, 1), :] + p2tab_ref[pl.ds(p2, 1), :]   # (1, 128)

    out_ref[0] = pos_row                    # full-width, lane-dense store
    out_ref[0, :, 0:dw] = wrow_ref[0]       # word row into columns [0, Dw)


def embedding_forward(word, pos1, pos2, word_table, pos1_table, pos2_table):
    B, L = word.shape
    N = B * L
    V, Dw = word_table.shape
    P, Dp = pos1_table.shape
    out_dim = Dw + 2 * Dp
    assert out_dim <= _LANE, "embedding width must fit one 128-lane vreg row"

    # Flatten + clamp ids (matches jnp.take clamp semantics; also guards the
    # data-dependent row-gather DMA against out-of-range indices).
    wids = jnp.clip(word.reshape(N).astype(jnp.int32), 0, V - 1)
    p1ids = jnp.clip(pos1.reshape(N).astype(jnp.int32), 0, P - 1)
    p2ids = jnp.clip(pos2.reshape(N).astype(jnp.int32), 0, P - 1)

    # One-time wrapper-side layout plumbing: place the tiny pos tables at their
    # final output column offsets inside a lane-dense 128-wide slab.
    pos1_wide = jnp.zeros((P, _LANE), jnp.float32).at[:, Dw:Dw + Dp].set(
        pos1_table.astype(jnp.float32))
    pos2_wide = jnp.zeros((P, _LANE), jnp.float32).at[:, Dw + Dp:out_dim].set(
        pos2_table.astype(jnp.float32))

    # Word table viewed as (V, 1, Dw): per-row blocks then have full last-two dims.
    word_table_3d = word_table.astype(jnp.float32).reshape(V, 1, Dw)

    grid_spec = pltpu.PrefetchScalarGridSpec(
        num_scalar_prefetch=3,
        grid=(N,),
        in_specs=[
            # Word table: true row gather, one (1, 1, Dw) row DMA'd per token;
            # the full table never has to fit in VMEM.
            pl.BlockSpec((1, 1, Dw), lambda i, w, p1, p2: (w[i], 0, 0)),
            # Tiny pos tables: VMEM-resident (same block every step -> loaded once).
            pl.BlockSpec((P, _LANE), lambda i, w, p1, p2: (0, 0)),
            pl.BlockSpec((P, _LANE), lambda i, w, p1, p2: (0, 0)),
        ],
        out_specs=pl.BlockSpec((1, 1, _LANE), lambda i, w, p1, p2: (i, 0, 0)),
    )

    out_padded = pl.pallas_call(
        _embedding_kernel,
        out_shape=jax.ShapeDtypeStruct((N, 1, _LANE), jnp.float32),
        grid_spec=grid_spec,
        compiler_params=pltpu.CompilerParams(
            dimension_semantics=("parallel",)),
    )(wids, p1ids, p2ids, word_table_3d, pos1_wide, pos2_wide)

    # Lane-dense kernel output -> (B, L, 60) outside the kernel.
    return out_padded[:, 0, :out_dim].reshape(B, L, out_dim)


def make_params(key, vocab_size, max_length, word_dim=50, pos_dim=5):
    kw, kp1, kp2 = jax.random.split(key, 3)
    # word_vec_mat is copied verbatim into the word embedding table (padding_idx
    # has no effect on forward values because the weights are overwritten).
    word_table = jax.random.normal(kw, (vocab_size, word_dim), jnp.float32)
    # pos embeddings: nn.Embedding init with padding_idx=0 row zeroed.
    pos1_table = jax.random.normal(kp1, (2 * max_length, pos_dim), jnp.float32)
    pos2_table = jax.random.normal(kp2, (2 * max_length, pos_dim), jnp.float32)
    pos1_table = pos1_table.at[0].set(0.0)
    pos2_table = pos2_table.at[0].set(0.0)
    return word_table, pos1_table, pos2_table


if __name__ == "__main__":
    key = jax.random.PRNGKey(0)
    kparams, kw, kp1, kp2 = jax.random.split(key, 4)

    # Small, module-consistent shapes.
    batch = 2
    max_length = 16          # sequence length L == max_length
    vocab_size = 32
    word_dim = 50
    pos_dim = 5

    word_table, pos1_table, pos2_table = make_params(
        kparams, vocab_size, max_length, word_dim, pos_dim)

    word = jax.random.randint(kw, (batch, max_length), 0, vocab_size, jnp.int32)
    pos1 = jax.random.randint(kp1, (batch, max_length), 0, 2 * max_length, jnp.int32)
    pos2 = jax.random.randint(kp2, (batch, max_length), 0, 2 * max_length, jnp.int32)

    out = embedding_forward(word, pos1, pos2, word_table, pos1_table, pos2_table)
    out = jax.block_until_ready(out)

    # Reference check (plain JAX gathers + concat).
    ref = jnp.concatenate(
        [jnp.take(word_table, word, axis=0),
         jnp.take(pos1_table, pos1, axis=0),
         jnp.take(pos2_table, pos2, axis=0)],
        axis=2)
    assert out.shape == (batch, max_length, word_dim + 2 * pos_dim)
    assert jnp.allclose(out, ref, atol=1e-5), "mismatch vs reference"

    print("KERNEL_OK")
</pallas_src>

<mosaic_0001>
module attributes {stable_mosaic.version = 11 : i64} {
  func.func @_embedding_kernel(%arg0: i32, %arg1: memref<32xi32, #tpu.memory_space<smem>>, %arg2: memref<32xi32, #tpu.memory_space<smem>>, %arg3: memref<32xi32, #tpu.memory_space<smem>>, %arg4: memref<1x1x50xf32, #tpu.memory_space<vmem>>, %arg5: memref<32x128xf32, #tpu.memory_space<vmem>>, %arg6: memref<32x128xf32, #tpu.memory_space<vmem>>, %arg7: memref<1x1x128xf32, #tpu.memory_space<vmem>>) attributes {dimension_semantics = [#tpu.dimension_semantics<parallel>], iteration_bounds = array<i64: 32>, scalar_prefetch = 3 : i64, scratch_operands = 0 : i64, tpu.core_type = #tpu.core_type<tc>, window_params = [{transform_indices = @transform_0, window_bounds = array<i64: 1, 1, 50>}, {pipeline_mode = #tpu.pipeline_mode<synchronous>, transform_indices = @transform_1, window_bounds = array<i64: 32, 128>}, {pipeline_mode = #tpu.pipeline_mode<synchronous>, transform_indices = @transform_2, window_bounds = array<i64: 32, 128>}, {transform_indices = @transform_3, window_bounds = array<i64: 1, 1, 128>}]} {
    %0 = arith.index_cast %arg0 : i32 to index
    %1 = memref.load %arg2[%0] : memref<32xi32, #tpu.memory_space<smem>>
    %2 = arith.index_cast %arg0 : i32 to index
    %3 = memref.load %arg3[%2] : memref<32xi32, #tpu.memory_space<smem>>
    %4 = arith.index_cast %1 : i32 to index
    %c0 = arith.constant 0 : index
    %5 = vector.load %arg5[%4, %c0] : memref<32x128xf32, #tpu.memory_space<vmem>>, vector<1x128xf32>
    %6 = arith.index_cast %3 : i32 to index
    %c0_0 = arith.constant 0 : index
    %7 = vector.load %arg6[%6, %c0_0] : memref<32x128xf32, #tpu.memory_space<vmem>>, vector<1x128xf32>
    %8 = arith.addf %5, %7 : vector<1x128xf32>
    %c0_1 = arith.constant 0 : index
    %c0_2 = arith.constant 0 : index
    %c0_3 = arith.constant 0 : index
    %9 = vector.load %arg7[%c0_1, %c0_2, %c0_3] : memref<1x1x128xf32, #tpu.memory_space<vmem>>, vector<1x1x128xf32>
    %10 = vector.shape_cast %9 : vector<1x1x128xf32> to vector<1x128xf32>
    %11 = vector.shape_cast %8 : vector<1x128xf32> to vector<1x1x128xf32>
    tpu.vector_store %arg7[%c0_1, %c0_2, %c0_3], %11 {strides = array<i32>} : memref<1x1x128xf32, #tpu.memory_space<vmem>>, vector<1x1x128xf32>,
    %c0_4 = arith.constant 0 : index
    %c0_5 = arith.constant 0 : index
    %c0_6 = arith.constant 0 : index
    %12 = vector.load %arg4[%c0_4, %c0_5, %c0_6] : memref<1x1x50xf32, #tpu.memory_space<vmem>>, vector<1x1x50xf32>
    %13 = vector.shape_cast %12 : vector<1x1x50xf32> to vector<1x50xf32>
    %c0_7 = arith.constant 0 : index
    %c0_8 = arith.constant 0 : index
    %c0_9 = arith.constant 0 : index
    %14 = vector.load %arg7[%c0_7, %c0_8, %c0_9] : memref<1x1x128xf32, #tpu.memory_space<vmem>>, vector<1x1x50xf32>
    %15 = vector.shape_cast %14 : vector<1x1x50xf32> to vector<1x50xf32>
    %16 = vector.shape_cast %13 : vector<1x50xf32> to vector<1x1x50xf32>
    tpu.vector_store %arg7[%c0_7, %c0_8, %c0_9], %16 {strides = array<i32>} : memref<1x1x128xf32, #tpu.memory_space<vmem>>, vector<1x1x50xf32>,
    return
  }
  func.func @transform_0(%arg0: i32, %arg1: memref<32xi32, #tpu.memory_space<smem>>, %arg2: memref<32xi32, #tpu.memory_space<smem>>, %arg3: memref<32xi32, #tpu.memory_space<smem>>) -> (i32, i32, i32) {
    %0 = arith.index_cast %arg0 : i32 to index
    %1 = memref.load %arg1[%0] : memref<32xi32, #tpu.memory_space<smem>>
    %c0_i32 = arith.constant 0 : i32
    %c0_i32_0 = arith.constant 0 : i32
    %c0_i32_1 = arith.constant 0 : i32
    return %1, %c0_i32, %c0_i32_0 : i32, i32, i32
  }
  func.func @transform_1(%arg0: i32, %arg1: memref<32xi32, #tpu.memory_space<smem>>, %arg2: memref<32xi32, #tpu.memory_space<smem>>, %arg3: memref<32xi32, #tpu.memory_space<smem>>) -> (i32, i32) {
    %c0_i32 = arith.constant 0 : i32
    %c0_i32_0 = arith.constant 0 : i32
    %c0_i32_1 = arith.constant 0 : i32
    return %c0_i32, %c0_i32_0 : i32, i32
  }
  func.func @transform_2(%arg0: i32, %arg1: memref<32xi32, #tpu.memory_space<smem>>, %arg2: memref<32xi32, #tpu.memory_space<smem>>, %arg3: memref<32xi32, #tpu.memory_space<smem>>) -> (i32, i32) {
    %c0_i32 = arith.constant 0 : i32
    %c0_i32_0 = arith.constant 0 : i32
    %c0_i32_1 = arith.constant 0 : i32
    return %c0_i32, %c0_i32_0 : i32, i32
  }
  func.func @transform_3(%arg0: i32, %arg1: memref<32xi32, #tpu.memory_space<smem>>, %arg2: memref<32xi32, #tpu.memory_space<smem>>, %arg3: memref<32xi32, #tpu.memory_space<smem>>) -> (i32, i32, i32) {
    %c0_i32 = arith.constant 0 : i32
    %c0_i32_0 = arith.constant 0 : i32
    %c0_i32_1 = arith.constant 0 : i32
    return %arg0, %c0_i32, %c0_i32_0 : i32, i32, i32
  }
}

</mosaic_0001>

<bundles_post_ra>
// kernel: tpu_custom_call.1
= control target key start
LH: loop header
LB: loop body
LE: loop exit
PB: predicated region body
PF: predicated region fallthrough
CT: control target
= control target key end

     0   :  { %s682_s27 = smov [#allocation3]   ;;  %s683_s28 = smov [#allocation4]   ;;  %s902_s0 = inlined_call_operand.hbm [shape: s32[32], index: 0, kind: input, shape index: {}]   ;;  %s903_s3 = inlined_call_operand.hbm [shape: f32[32,1,50], index: 3, kind: input, shape index: {}]   ;;  %s904_s4 = inlined_call_operand.hbm [shape: f32[32,128], index: 4, kind: input, shape index: {}]   ;;  %s905_s5 = inlined_call_operand.hbm [shape: f32[32,128], index: 5, kind: input, shape index: {}]   ;;  %s906_s6 = inlined_call_operand.hbm [shape: f32[32,1,128], index: 6, kind: output, shape index: {}]   ;;  %s907_s1 = inlined_call_operand.hbm [shape: s32[32], index: 1, kind: input, shape index: {}]   ;;  %s908_s2 = inlined_call_operand.vmem [shape: s32[32], index: 2, kind: input, shape index: {}]  }
   0x1   :  { %909 = sst [smem:[#allocation20_spill]] %s904_s4  ;;  %s12_s23 = sshll.u32 %s902_s0, 4  ;;  %s13_s23 = int_to_ptr.hbm [resolvable:$true] %s12_s23 }
   0x2   :  { %910 = sst [smem:[#allocation21_spill]] %s905_s5  ;;  %s17_s26 = sshll.u32 %s907_s1, 4  ;;  %s18_s26 = int_to_ptr.hbm [resolvable:$true] %s17_s26 }
   0x3   :  { %15 = dma.hbm_to_smem %s13_s23, 16, %s682_s27, [#allocation2] }
   0x4   :  { %20 = dma.hbm_to_smem %s18_s26, 16, %s683_s28, [#allocation2] }
   0x5   :  { %s22_s7 = sshll.u32 %s908_s2, 4  ;;  %s684_s8 = smov [#allocation5]   ;;  %s23_s7 = int_to_ptr.vmem [resolvable:$true] %s22_s7 }
   0x6   :  { %25 = dma.vmem_to_smem %s23_s7, 16, %s684_s8, [#allocation2] }
   0x7   :  { %640 = dma.done.wait [#allocation2], 48 }
   0x8   :  { %641 = vsyncadd [#allocation2], 4294967248 }
   0x9   :  { %28 = sfence }
   0xa   :  { %29 = vsyncpa [#allocation7], 0 }
   0xb   :  { %31 = vsyncpa [#allocation7 + $0x1], 0 }
   0xc   :  { %32 = vsyncpa [#allocation10], 0 }
   0xd   :  { %33 = vsyncpa [#allocation8], 0 }
   0xe   :  { %35 = vsyncpa [#allocation8 + $0x1], 0  ;;  %s733_s0 = smov 0   ;;  %s735_s1 = smov 0  }
   0xf   :  { %s737_s9 = smov 0   ;;  %s739_s10 = smov 0  }
  0x10   :  { %s741_s2 = smov 0   ;;  %s743_s11 = smov 0  }
  0x11   :  { %s745_s12 = smov 0  }
  0x12 LB: > { %s769_s13 = sadd.s32 4294967295, %s680_s12   ;;  %s348_s14 = sadd.s32 4294967294, %s680_s12   ;;  %s680_s12 = sphi %s745_s12, %s926_s12   ;;  %s676_s11 = sphi %s743_s11, %s925_s11   ;;  %s672_s2 = sphi %s741_s2, %s924_s2   ;;  %s668_s10 = sphi %s739_s10, %s923_s10   ;;  %s664_s9 = sphi %s737_s9, %s922_s9   ;;  %s660_s1 = sphi %s735_s1, %s921_s1   ;;  %s656_s0 = sphi %s733_s0, %s920_s0  }
  0x13   : > { %p64_p0 = scmp.eq.s32.totalorder %s769_s13, 0  ;;  %p128_p1 = scmp.ne.s32.totalorder %s664_s9, %s660_s1 }
  0x14   : > { %p129_p2 = scmp.eq.s32.totalorder %s769_s13, 31  ;;  %p134_p3 = scmp.ne.s32.totalorder %s660_s1, %s656_s0 }
  0x15   : > { %p135_p4 = scmp.eq.s32.totalorder %s348_s14, 31  ;;  %p349_p6 = scmp.ge.s32.totalorder %s680_s12, 1 }
  0x16   : > { %p778_p5 = por %p129_p2, %p128_p1  ;;  %p142_p8 = scmp.lt.s32.totalorder %s680_s12, 33 }
  0x17   : > { %p783_p7 = por %p135_p4, %p134_p3  ;;  %s913_s4 = sld [smem:[#allocation20_spill]] }
  0x18   : > { %p791_p9 = pnand %p349_p6, %p142_p8  ;;  %s685_s21 = smov [#allocation9]  }
  0x19   : > { %s155_s22 = sshll.u32 %s685_s21, 4  ;;  %s915_s5 = sld [smem:[#allocation21_spill]]  ;;  %s156_s22 = int_to_ptr.vmem [resolvable:$true] %s155_s22 }
  0x1a   : > { %p372_p10 = pneg %p791_p9  ;;  %s686_s26 = smov 128  }
  0x1b   : > { %s687_s27 = smov 8   ;;  %s688_s28 = smov [#allocation11]  }
  0x1c   : > { %p373_p11 = pnand %p372_p10, %p64_p0  ;;  %s169_s29 = sshll.u32 %s688_s28, 4  ;;  %s170_s29 = int_to_ptr.vmem [resolvable:$true] %s169_s29 }
  0x1d   : > { %s153_s19 = sshll.u32 %s913_s4, 4  ;;  %s803_s30 = sadd.s32 1, %s680_s12   ;;  %s154_s19 = int_to_ptr.hbm [resolvable:$true] %s153_s19 }
  0x1e   : > { %375 = dma.hbm_to_vmem [thread:$0]  (!%p373_p11), %s154_s19, 512, %s156_s22, [#allocation10], %s686_s26, %s686_s26, %s687_s27  }
  0x1f   : > { %s167_s25 = sshll.u32 %s915_s5, 4  ;;  %s45_s7 = sld [smem:[#allocation3 + %s680_s12]]  ;;  %s168_s25 = int_to_ptr.hbm [resolvable:$true] %s167_s25 }
  0x20   : > { %378 = dma.hbm_to_vmem [thread:$0]  (!%p373_p11), %s168_s25, 512, %s170_s29, [#allocation10], %s686_s26, %s686_s26, %s687_s27  }
  0x21   : > { %s118_s8 = sadd.s32 1, %s664_s9  ;;  %s46_s14 = sld [smem:[#allocation3 + %s803_s30]] }
  0x22   : > { %p57_p12 = scmp.ne.s32.totalorder %s676_s11, %s672_s2  ;;  %p58_p13 = scmp.eq.s32.totalorder %s680_s12, 0 }
  0x23   : > { %p63_p1 = scmp.ne.s32.totalorder %s672_s2, %s668_s10  ;;  %s115_s17 = ssub.s32 %s680_s12, %s803_s30 }
  0x24   : > { %s50_s18 = sadd.s32 1, %s676_s11  ;;  %p116_p2 = scmp.eq.s32.totalorder %s115_s17, 0 }
  0x25   : > { %p59_p3 = por %p58_p13, %p57_p12  ;;  %p818_p4 = por %p64_p0, %p63_p1 }
  0x26   : > { %s823_s21 = scalar_select %p116_p2, %s664_s9, %s118_s8  }
  0x27   : > { %s47_s22 = ssub.s32 %s45_s7, %s46_s14  ;;  %p391_p6 = scmp.lt.s32.totalorder %s680_s12, 32 }
  0x28   : > { %p48_p8 = scmp.eq.s32.totalorder %s47_s22, 0  ;;  %s183_s23 = sand.u32 1, %s676_s11  }
  0x29   : > { %p827_p10 = pnand %p391_p6, %p59_p3  ;;  %s186_s28 = scalar_lea.vmem [#allocation6], %s183_s23 }
  0x2a   : > { %s832_s10 = scalar_select %p48_p8, %s676_s11, %s50_s18  }
  0x2b   : > { %s362_s25 = scalar_select %p59_p3, [#allocation3], [#allocation13] }
  0x2c   : > { %918 = sst [smem:[#allocation19_spill]] %s832_s10  ;;  %s194_s29 = sshll.u32 %s186_s28, 4  ;;  %s195_s29 = int_to_ptr.vmem [resolvable:$true] %s194_s29 }
  0x2d   : > { %s363_s26 = scalar_select %p59_p3, %s680_s12, 0 }
  0x2e   : > { %s928_s25 = smov (!%p391_p6, %s362_s25), [#allocation14]  ;;  %s184_s22 = scalar_lea.sflag [#allocation7], %s183_s23 }
  0x2f   : > { %s930_s26 = smov (!%p391_p6, %s363_s26), 0  ;;  %p558_p12 = pneg %p827_p10 }
  0x30   : > { %s187_s27 = sld [smem:[%s928_s25 + %s930_s26]]  ;;  %s561_s26 = scalar_lea.hbm %s903_s3, 32 }
  0x36   : > { %s190_s7 = scalar_lea.hbm %s903_s3, %s187_s27 }
  0x37   : > { %s192_s14 = sshll.u32 %s190_s7, 4  ;;  %s193_s14 = int_to_ptr.hbm [resolvable:$true] %s192_s14 }
  0x38   : > { %s554_s4 = sshra.s32 %s193_s14, 4  ;;  %s555_s4 = int_to_ptr.hbm [resolvable:$true] %s554_s4 }
  0x39   : > { %s556_s18 = scalar_lea.hbm %s555_s4, 1  ;;  %p562_p2 = scmp.lt.s32.totalorder %s555_s4, %s903_s3 }
  0x3a   : > { %p557_p11 = scmp.ne.s32.totalorder %s555_s4, %s556_s18  ;;  %p563_p3 = scmp.lt.s32.totalorder %s561_s26, %s556_s18 }
  0x3c   : > { %p559_p13 = pnand %p558_p12, %p557_p11  ;;  %p564_p6 = por %p563_p3, %p562_p2 }
  0x3e   : > { %p560_p1 = pneg %p559_p13 }
  0x40   : > { %p565_p8 = pnand %p564_p6, %p560_p1 }
  0x42   : > { %568 = shalt.err (!%p565_p8)
}
  0x43   : > { %384 = dma.hbm_to_vmem [thread:$0]  (!%p827_p10), %s193_s14, 16, %s195_s29, %s184_s22  }
  0x44   : > { %203 = sbr.rel (%p791_p9) target bundleno = 92 (0x5c), region = 32  ;;  %s205_s23 = sand.u32 (!%p791_p9), 1, %s672_s2  }
  0x45   : > { %s206_s27 = scalar_lea.sflag (!%p791_p9), [#allocation7], %s205_s23  ;;  %s208_s5 = scalar_lea.vmem (!%p791_p9), [#allocation6], %s205_s23 }
  0x49   : > { %643 = dma.done.wait (%p818_p4), %s206_s27, 16  }
  0x4a   : > { %645 = vsyncadd (%p818_p4), %s206_s27, 4294967280 }
  0x4b   : > { %647 = dma.done.wait (%p64_p0), [#allocation10], 1024  }
  0x4c   : > { %649 = vsyncadd (%p64_p0), [#allocation10], 4294966272  ;;  %s238_s4 = sand.u32 1, %s660_s1   ;;  %s241_s20 = sld [smem:[#allocation4 + %s769_s13]]  ;;  %v249_v3 = vld [vmem:[%s208_s5] sm:$0x1] }
  0x4d   : > { %s242_s24 = sld [smem:[#allocation5 + %s769_s13]]  ;;  %s261_s8 = scalar_lea.hbm %s906_s6, %s769_s13  ;;  %vm250_vm0 = vcmask 401408  }
  0x4e   : > { %s239_s17 = scalar_lea.vmem [#allocation12], %s238_s4  ;;  %s265_s14 = sshll.u32 %s261_s8, 4  ;;  %s266_s14 = int_to_ptr.hbm [resolvable:$true] %s265_s14 }
  0x4f   : > { %s263_s19 = sshll.u32 %s239_s17, 4  ;;  %s253_s18 = scalar_lea.sflag [#allocation8], %s238_s4  ;;  %s264_s19 = int_to_ptr.vmem [resolvable:$true] %s263_s19 }
  0x50   : > { %s598_s25 = sshra.s32 %s266_s14, 4  ;;  %s604_s23 = scalar_lea.hbm %s906_s6, 32  ;;  %s599_s25 = int_to_ptr.hbm [resolvable:$true] %s598_s25 }
  0x51   : > { %s600_s26 = scalar_lea.hbm %s599_s25, 1  ;;  %p605_p10 = scmp.lt.s32.totalorder %s599_s25, %s906_s6 }
  0x52   : > { %s243_s7 = scalar_lea.vmem [#allocation9], %s241_s20  ;;  %p601_p0 = scmp.ne.s32.totalorder %s599_s25, %s600_s26 }
  0x53   : > { %v244_v0 = vld [vmem:[%s243_s7] sm:$0x1]  ;;  %s245_s22 = scalar_lea.vmem [#allocation11], %s242_s24  ;;  %p606_p11 = scmp.lt.s32.totalorder %s604_s23, %s600_s26 }
  0x54   : > { %v246_v1 = vld [vmem:[%s245_s22] sm:$0x1]  ;;  %p602_p9 = pnand %p601_p0, %p778_p5 }
  0x55   : > { %v247_v2 = vadd.f32 %v246_v1, %v244_v0  ;;  %p607_p12 = por %p606_p11, %p605_p10 }
  0x56   : > { %p603_p4 = pneg %p602_p9 }
  0x57   : > { %248 = vst [vmem:[%s239_s17] sm:$0x1] %v247_v2 }
  0x58   : > { %251 = vst.msk [vmem:[%s239_s17] sm:$0x1] %vm250_vm0, %v249_v3  ;;  %p608_p13 = pnand %p607_p12, %p603_p4 }
  0x5a   : > { %611 = shalt.err (!%p608_p13)
}
  0x5b   : > { %370 = dma.vmem_to_hbm [thread:$0]  (%p778_p5), %s264_s19, 16, %s266_s14, %s253_s18  }
  0x5c PF: > { %p394_p1 = scmp.ge.s32.totalorder %s680_s12, 2  ;;  %s277_s5 = sand.u32 1, %s656_s0  }
  0x5d   : > { %s278_s4 = scalar_lea.sflag [#allocation8], %s277_s5 }
  0x5e   : > { %p386_p2 = pnand %p394_p1, %p783_p7 }
  0x60   : > { %p387_p3 = pneg %p386_p2 }
  0x62   : > { %651 = dma.done.wait (%p387_p3), %s278_s4, 16  }
  0x63   : > { %653 = vsyncadd (%p387_p3), %s278_s4, 4294967280  ;;  %s919_s15 = sld [smem:[#allocation19_spill]]  ;;  %p38_p5 = scmp.ge.s32.totalorder %s803_s30, 34  }
  0x64   : > { %s920_s0 = smov %s660_s1  ;;  %s921_s1 = smov %s664_s9 }
  0x65   : > { %s922_s9 = smov %s823_s21  ;;  %s923_s10 = smov %s672_s2 }
  0x66   : > { %s924_s2 = smov %s676_s11  ;;  %s926_s12 = smov %s803_s30 }
  0x67   :  { %40 = sbr.rel (!%p38_p5) target bundleno = 18 (0x12), region = 87 }
  0x69   : > { %s925_s11 = smov %s919_s15 }
  0x6c   :  { %283 = vsyncpa [#allocation7], 1 }
  0x6d   :  { %285 = vsyncpa [#allocation7 + $0x1], 1 }
  0x6e   :  { %286 = vsyncpa [#allocation10], 1 }
  0x6f   :  { %287 = vsyncpa [#allocation8], 1 }
  0x70   :  { %289 = vsyncpa [#allocation8 + $0x1], 1 }

</bundles_post_ra>
